<compile_context>
chip_gen: v7x
topology: tpu7x:2x2x1
jax: 0.10.0
libtpu: 0.0.40
codegen_flags: <defaults>
</compile_context>

<pallas_src>
import functools

import jax
import jax.numpy as jnp
from jax.experimental import pallas as pl
from jax.experimental.pallas import tpu as pltpu


_COMPILER_PARAMS = pltpu.CompilerParams(
    dimension_semantics=("parallel",),       # column/batch tiles are independent
    vmem_limit_bytes=32 * 1024 * 1024,       # v7x-safe; ample for these working sets
)


# -----------------------------------------------------------------------------
# Fused Conv2d(3x3, stride 1, pad 1) + ReLU + MaxPool2d(2, 2) kernel
# -----------------------------------------------------------------------------
def _conv_relu_pool_kernel(x_ref, w_ref, b_ref, o_ref, *, grid_w):
    """One grid step of the fused conv + bias + ReLU + maxpool stage.

    x_ref : (4*Cin, Mt) bf16   zero-padded input, 2x2-polyphase decomposed.
                               Row = (rh*2+rw)*Cin + c; column = b*G*G + i*G + j
                               with G = grid_w (per-image pitch G*G; blocks hold
                               whole images so lane shifts never cross images
                               for valid output columns).
    w_ref : (4*Cout, 16*Cin) bf16   phase/shift-folded conv weight (resident).
    b_ref : (Cout, 1) f32
    o_ref : (Cout, Mt) bf16    pooled activation on the same (b, i, j) grid
                               (valid for i < H/2, j < W/2; rest is don't-care).
    """
    x = x_ref[...]

    def shift_left(v, d):
        # Columns shifted left by d (wrap within the block).  Wrapped lanes only
        # ever feed pool-padding output columns, which are discarded downstream.
        # (pltpu.roll would also work; explicit concat keeps semantics obvious.)
        return jnp.concatenate([v[:, d:], v[:, :d]], axis=1)

    # K-stack of the 4 shifted copies: shift group (qh, qw) -> shift qh*G + qw.
    z = jnp.concatenate(
        [x, shift_left(x, 1), shift_left(x, grid_w), shift_left(x, grid_w + 1)],
        axis=0)                                                      # (16*Cin, Mt)

    # ONE MXU matmul covering all 9 taps x 4 pool phases (f32 accumulation).
    y = jnp.dot(w_ref[...], z, preferred_element_type=jnp.float32)   # (4*Cout, Mt)

    # Max over the 4 pool phases (sublane row-groups), then bias + ReLU.
    cout = o_ref.shape[0]
    m = jnp.maximum(jnp.maximum(y[0 * cout:1 * cout, :], y[1 * cout:2 * cout, :]),
                    jnp.maximum(y[2 * cout:3 * cout, :], y[3 * cout:4 * cout, :]))
    o_ref[...] = jnp.maximum(m + b_ref[...], 0.0).astype(o_ref.dtype)


def conv3x3_relu_pool(x_poly, w_folded, b_col, *, grid_w, max_cols=8192):
    """x_poly (4*Cin, M=B*G*G) bf16 -> (Cout, M_pad) bf16 pooled activation."""
    k4, m = x_poly.shape
    four_cout, k16 = w_folded.shape
    cout = four_cout // 4
    pitch = grid_w * grid_w                        # columns per image

    # Column tile = whole images and a multiple of 128 lanes (no masked edges).
    unit = pitch
    while unit % 128:
        unit *= 2
    n_units = pl.cdiv(m, unit)
    tile_units = min(n_units, max(1, max_cols // unit))
    if n_units >= 2:                               # >= 2 steps: pipelining + both v7x TCs
        tile_units = min(tile_units, (n_units + 1) // 2)
    grid = pl.cdiv(n_units, tile_units)
    mt = tile_units * unit
    m_pad = grid * mt
    if m_pad != m:                                 # zero "fake images"; outputs discarded
        x_poly = jnp.pad(x_poly, ((0, 0), (0, m_pad - m)))

    flops = 2 * four_cout * k16 * m_pad + 6 * cout * m_pad
    bytes_accessed = (k4 * m_pad + four_cout * k16 + cout * m_pad) * 2 + cout * 4

    kernel = functools.partial(_conv_relu_pool_kernel, grid_w=grid_w)
    return pl.pallas_call(
        kernel,
        grid=(grid,),
        in_specs=[pl.BlockSpec((k4, mt), lambda i: (0, i)),
                  pl.BlockSpec((four_cout, k16), lambda i: (0, 0)),
                  pl.BlockSpec((cout, 1), lambda i: (0, 0))],
        out_specs=pl.BlockSpec((cout, mt), lambda i: (0, i)),
        out_shape=jax.ShapeDtypeStruct((cout, m_pad), jnp.bfloat16),
        compiler_params=_COMPILER_PARAMS,
        cost_estimate=pl.CostEstimate(flops=flops, transcendentals=0,
                                      bytes_accessed=bytes_accessed),
    )(x_poly, w_folded, b_col)


# -----------------------------------------------------------------------------
# Fused fc1 -> ReLU -> fc2 -> ReLU -> fc3 kernel
# -----------------------------------------------------------------------------
def _mlp_kernel(x_ref, w1_ref, b1_ref, w2_ref, b2_ref, w3_ref, b3_ref, o_ref):
    h = jnp.dot(x_ref[...], w1_ref[...], preferred_element_type=jnp.float32)
    h = jnp.maximum(h + b1_ref[...], 0.0)                               # (tb, 128) f32
    h = jnp.dot(h.astype(w2_ref.dtype), w2_ref[...],
                preferred_element_type=jnp.float32)
    h = jnp.maximum(h + b2_ref[...], 0.0)                               # (tb, 64) f32 in VMEM
    h = jnp.dot(h.astype(w3_ref.dtype), w3_ref[...],
                preferred_element_type=jnp.float32)
    o_ref[...] = (h + b3_ref[...]).astype(o_ref.dtype)                  # (tb, 128) padded logits


def mlp_head(x_bf16, p, *, max_tb=1024):
    """x_bf16 (B, 1024) bf16 -> (B_pad, 128) f32 zero-padded logits."""
    b, k1 = x_bf16.shape
    tb = min(b, max_tb)
    if b >= 16:
        tb = max(16, (tb // 16) * 16)              # bf16 sublane packing
    if b >= 256:                                    # >= 2 steps for the two v7x TCs
        tb = min(tb, ((b + 1) // 2 + 15) // 16 * 16)
    gb = pl.cdiv(b, tb)
    b_pad = gb * tb
    if b_pad != b:                                  # no masked edge blocks
        x_bf16 = jnp.pad(x_bf16, ((0, b_pad - b), (0, 0)))

    flops = 2 * b_pad * (k1 * 128 + 128 * 64 + 64 * 128)
    bytes_accessed = (b_pad * k1 + k1 * 128 + 128 * 64 + 64 * 128) * 2 + b_pad * 128 * 4

    return pl.pallas_call(
        _mlp_kernel,
        grid=(gb,),
        in_specs=[
            pl.BlockSpec((tb, k1), lambda i: (i, 0)),
            pl.BlockSpec((k1, 128), lambda i: (0, 0)),
            pl.BlockSpec((1, 128), lambda i: (0, 0)),
            pl.BlockSpec((128, 64), lambda i: (0, 0)),
            pl.BlockSpec((1, 64), lambda i: (0, 0)),
            pl.BlockSpec((64, 128), lambda i: (0, 0)),
            pl.BlockSpec((1, 128), lambda i: (0, 0)),
        ],
        out_specs=pl.BlockSpec((tb, 128), lambda i: (i, 0)),
        out_shape=jax.ShapeDtypeStruct((b_pad, 128), jnp.float32),
        compiler_params=_COMPILER_PARAMS,
        cost_estimate=pl.CostEstimate(flops=flops, transcendentals=0,
                                      bytes_accessed=bytes_accessed),
    )(x_bf16, p["fc1_w"], p["fc1_b"], p["fc2_w"], p["fc2_b"], p["fc3_w"], p["fc3_b"])


# -----------------------------------------------------------------------------
# Parameters (PyTorch layout) and one-time kernel-layout preparation
# -----------------------------------------------------------------------------
def init_params(key):
    """PyTorch-layout parameters (Conv2d OIHW, Linear (out, in)), uniform fan-in init."""
    ks = jax.random.split(key, 10)

    def u(k, shape, fan_in):
        bound = 1.0 / jnp.sqrt(jnp.float32(fan_in))
        return jax.random.uniform(k, shape, jnp.float32, -bound, bound)

    return {
        "conv1_w": u(ks[0], (8, 1, 3, 3), 1 * 9),
        "conv1_b": u(ks[1], (8,), 1 * 9),
        "conv2_w": u(ks[2], (16, 8, 3, 3), 8 * 9),
        "conv2_b": u(ks[3], (16,), 8 * 9),
        "fc1_w":   u(ks[4], (128, 16 * 7 * 7), 16 * 7 * 7),
        "fc1_b":   u(ks[5], (128,), 16 * 7 * 7),
        "fc2_w":   u(ks[6], (64, 128), 128),
        "fc2_b":   u(ks[7], (64,), 128),
        "fc3_w":   u(ks[8], (10, 64), 64),
        "fc3_b":   u(ks[9], (10,), 64),
    }


def _fold_conv_weight(w_oihw):
    """(Cout, Cin, 3, 3) PyTorch conv weight -> (4*Cout, 16*Cin) bf16.

    Row    = (ph*2 + pw)*Cout + o                       (pool/output phase)
    Column = (qh*2 + qw)*4*Cin + (rh*2 + rw)*Cin + c    (shift group, input phase, channel)
    Entry  = W[o, c, di, dj] with di = 2*qh + rh - ph, dj = 2*qw + rw - pw when
             both lie in [0, 3); zero otherwise (9 of the 16 combos are live
             per output phase).
    """
    cout, cin = w_oihw.shape[0], w_oihw.shape[1]
    w = jnp.asarray(w_oihw, jnp.float32)
    wt = jnp.zeros((4, cout, 4, 4, cin), jnp.float32)
    for ph in range(2):
        for pw in range(2):
            p = ph * 2 + pw
            for qh in range(2):
                for qw in range(2):
                    s = qh * 2 + qw
                    for rh in range(2):
                        for rw in range(2):
                            r = rh * 2 + rw
                            di = 2 * qh + rh - ph
                            dj = 2 * qw + rw - pw
                            if 0 <= di < 3 and 0 <= dj < 3:
                                wt = wt.at[p, :, s, r, :].set(w[:, :, di, dj])
    return wt.reshape(4 * cout, 16 * cin).astype(jnp.bfloat16)


def prepare_params(params):
    """One-time conversion into kernel-friendly layouts (not repeated per forward)."""
    # fc1: PyTorch flattens (c, h, w) of the 16x7x7 map; our activation arrives as
    # (c, i, j) on the pool-padded 8x8 grid -> re-permute + zero-pad the weight so
    # the pool-padding columns (i == 7 or j == 7) contribute nothing.
    w1 = params["fc1_w"].reshape(128, 16, 7, 7)                       # (out, c, h, w)
    w1p = jnp.zeros((16, 8, 8, 128), jnp.float32)
    w1p = w1p.at[:, :7, :7, :].set(jnp.transpose(w1, (1, 2, 3, 0)))   # (c, i, j, out)
    w1p = w1p.reshape(16 * 64, 128)

    w3 = jnp.pad(params["fc3_w"].T, ((0, 0), (0, 118)))               # (64, 128) padded logits
    b3 = jnp.pad(params["fc3_b"], (0, 118))

    return {
        "conv1_w": _fold_conv_weight(params["conv1_w"]),              # (32, 16) bf16
        "conv1_b": params["conv1_b"].reshape(8, 1).astype(jnp.float32),
        "conv2_w": _fold_conv_weight(params["conv2_w"]),              # (64, 128) bf16
        "conv2_b": params["conv2_b"].reshape(16, 1).astype(jnp.float32),
        "fc1_w": w1p.astype(jnp.bfloat16),                            # (1024, 128)
        "fc1_b": params["fc1_b"].reshape(1, 128).astype(jnp.float32),
        "fc2_w": params["fc2_w"].T.astype(jnp.bfloat16),              # (128, 64)
        "fc2_b": params["fc2_b"].reshape(1, 64).astype(jnp.float32),
        "fc3_w": w3.astype(jnp.bfloat16),                             # (64, 128)
        "fc3_b": b3.reshape(1, 128).astype(jnp.float32),
    }


# -----------------------------------------------------------------------------
# Host-side polyphase glue + forward pass (matches MNIST_Convo.forward semantics)
# -----------------------------------------------------------------------------
def _polyphase(x_pad):
    """(C, B, 2G, 2G) zero-padded channel-major activation -> (4*C, B*G*G) with
    row = (rh*2 + rw)*C + c and column = b*G*G + i*G + j."""
    c, b, h2, _ = x_pad.shape
    g = h2 // 2
    phases = jnp.stack([x_pad[:, :, rh::2, rw::2]
                        for rh in (0, 1) for rw in (0, 1)], axis=0)    # (4, C, B, G, G)
    return phases.reshape(4 * c, b * g * g)


def mnist_convo_forward(prepared, x_nchw):
    """x_nchw (B, 1, 28, 28) f32 -> logits (B, 10) f32."""
    b = x_nchw.shape[0]

    # conv1 input: 28x28 image into a zero 32x32 frame (image at [1:29, 1:29]),
    # polyphase split -> (4, B*256) bf16.
    x = jnp.transpose(x_nchw, (1, 0, 2, 3))                            # (1, B, 28, 28)
    x = jnp.pad(x, ((0, 0), (0, 0), (1, 3), (1, 3))).astype(jnp.bfloat16)
    a1 = conv3x3_relu_pool(_polyphase(x), prepared["conv1_w"],
                           prepared["conv1_b"], grid_w=16)             # (8, >=B*256) bf16

    # conv2 input: valid 14x14 pooled map, zero ring, polyphase -> (32, B*64) bf16.
    a1 = a1[:, :b * 256].reshape(8, b, 16, 16)[:, :, :14, :14]
    a1 = jnp.pad(a1, ((0, 0), (0, 0), (1, 1), (1, 1)))                 # (8, B, 16, 16)
    a2 = conv3x3_relu_pool(_polyphase(a1), prepared["conv2_w"],
                           prepared["conv2_b"], grid_w=8)              # (16, >=B*64) bf16

    # MLP: single small channel-major -> batch-major relayout; fc1's weight was
    # pre-permuted to the (c, i, j) pool-padded ordering with zeroed pad columns.
    xf = jnp.transpose(a2[:, :b * 64].reshape(16, b, 64), (1, 0, 2)).reshape(b, 16 * 64)
    logits = mlp_head(xf, prepared)                                    # (B_pad, 128) f32
    return logits[:b, :10]


if __name__ == "__main__":
    key = jax.random.PRNGKey(0)
    pkey, xkey = jax.random.split(key)
    params = init_params(pkey)
    prepared = prepare_params(params)          # one-time weight-layout prep

    # MNIST-shaped input (28x28 so 16*7*7 matches fc_lyr1), small batch.
    x = jax.random.normal(xkey, (2, 1, 28, 28), jnp.float32)

    logits = jax.jit(mnist_convo_forward)(prepared, x)
    logits = jax.block_until_ready(logits)

    assert logits.shape == (2, 10), logits.shape
    assert logits.dtype == jnp.float32, logits.dtype
    assert bool(jnp.all(jnp.isfinite(logits))), "non-finite logits"
    print("KERNEL_OK")
</pallas_src>

<mosaic_0001>
module attributes {stable_mosaic.version = 11 : i64} {
  func.func @_conv_relu_pool_kernel(%arg0: i32, %arg1: memref<4x256xbf16, #tpu.memory_space<vmem>>, %arg2: memref<32x16xbf16, #tpu.memory_space<vmem>>, %arg3: memref<8x1xf32, #tpu.memory_space<vmem>>, %arg4: memref<8x256xbf16, #tpu.memory_space<vmem>>) attributes {dimension_semantics = [#tpu.dimension_semantics<parallel>], iteration_bounds = array<i64: 2>, scalar_prefetch = 0 : i64, scratch_operands = 0 : i64, tpu.core_type = #tpu.core_type<tc>, window_params = [{transform_indices = @transform_0, window_bounds = array<i64: 4, 256>}, {pipeline_mode = #tpu.pipeline_mode<synchronous>, transform_indices = @transform_1, window_bounds = array<i64: 32, 16>}, {pipeline_mode = #tpu.pipeline_mode<synchronous>, transform_indices = @transform_2, window_bounds = array<i64: 8, 1>}, {transform_indices = @transform_3, window_bounds = array<i64: 8, 256>}]} {
    %c0 = arith.constant 0 : index
    %c0_0 = arith.constant 0 : index
    %0 = vector.load %arg1[%c0, %c0_0] : memref<4x256xbf16, #tpu.memory_space<vmem>>, vector<4x256xbf16>
    %1 = vector.extract_strided_slice %0 {offsets = [0, 1], sizes = [4, 255], strides = [1, 1]} : vector<4x256xbf16> to vector<4x255xbf16>
    %2 = vector.extract_strided_slice %0 {offsets = [0, 0], sizes = [4, 1], strides = [1, 1]} : vector<4x256xbf16> to vector<4x1xbf16>
    %3 = tpu.concatenate %1, %2 in 1 : vector<4x255xbf16>, vector<4x1xbf16> -> vector<4x256xbf16>
    %4 = vector.extract_strided_slice %0 {offsets = [0, 16], sizes = [4, 240], strides = [1, 1]} : vector<4x256xbf16> to vector<4x240xbf16>
    %5 = vector.extract_strided_slice %0 {offsets = [0, 0], sizes = [4, 16], strides = [1, 1]} : vector<4x256xbf16> to vector<4x16xbf16>
    %6 = tpu.concatenate %4, %5 in 1 : vector<4x240xbf16>, vector<4x16xbf16> -> vector<4x256xbf16>
    %7 = vector.extract_strided_slice %0 {offsets = [0, 17], sizes = [4, 239], strides = [1, 1]} : vector<4x256xbf16> to vector<4x239xbf16>
    %8 = vector.extract_strided_slice %0 {offsets = [0, 0], sizes = [4, 17], strides = [1, 1]} : vector<4x256xbf16> to vector<4x17xbf16>
    %9 = tpu.concatenate %7, %8 in 1 : vector<4x239xbf16>, vector<4x17xbf16> -> vector<4x256xbf16>
    %10 = tpu.concatenate %0, %3, %6, %9 in 0 : vector<4x256xbf16>, vector<4x256xbf16>, vector<4x256xbf16>, vector<4x256xbf16> -> vector<16x256xbf16>
    %c0_1 = arith.constant 0 : index
    %c0_2 = arith.constant 0 : index
    %11 = vector.load %arg2[%c0_1, %c0_2] : memref<32x16xbf16, #tpu.memory_space<vmem>>, vector<32x16xbf16>
    %cst = arith.constant dense<0.000000e+00> : vector<32x256xf32>
    %12 = tpu.matmul %11, %10, %cst {dimension_numbers = #tpu.dot_dimension_numbers<[1], [0], [0], [1], [0, 0, 1, 1], [], []>} : vector<32x16xbf16>, vector<16x256xbf16>, vector<32x256xf32> -> vector<32x256xf32>
    %13 = vector.extract_strided_slice %12 {offsets = [0, 0], sizes = [8, 256], strides = [1, 1]} : vector<32x256xf32> to vector<8x256xf32>
    %14 = vector.extract_strided_slice %12 {offsets = [8, 0], sizes = [8, 256], strides = [1, 1]} : vector<32x256xf32> to vector<8x256xf32>
    %15 = arith.maximumf %13, %14 : vector<8x256xf32>
    %16 = vector.extract_strided_slice %12 {offsets = [16, 0], sizes = [8, 256], strides = [1, 1]} : vector<32x256xf32> to vector<8x256xf32>
    %17 = vector.extract_strided_slice %12 {offsets = [24, 0], sizes = [8, 256], strides = [1, 1]} : vector<32x256xf32> to vector<8x256xf32>
    %18 = arith.maximumf %16, %17 : vector<8x256xf32>
    %19 = arith.maximumf %15, %18 : vector<8x256xf32>
    %c0_3 = arith.constant 0 : index
    %c0_4 = arith.constant 0 : index
    %20 = vector.load %arg3[%c0_3, %c0_4] : memref<8x1xf32, #tpu.memory_space<vmem>>, vector<8x1xf32>
    %21 = vector.broadcast %20 : vector<8x1xf32> to vector<8x256xf32>
    %22 = arith.addf %19, %21 : vector<8x256xf32>
    %cst_5 = arith.constant 0.000000e+00 : f32
    %23 = vector.broadcast %cst_5 : f32 to vector<8x256xf32>
    %24 = arith.maximumf %22, %23 : vector<8x256xf32>
    %25 = arith.truncf %24 : vector<8x256xf32> to vector<8x256xbf16>
    %c0_6 = arith.constant 0 : index
    %c0_7 = arith.constant 0 : index
    %26 = vector.load %arg4[%c0_6, %c0_7] : memref<8x256xbf16, #tpu.memory_space<vmem>>, vector<8x256xbf16>
    tpu.vector_store %arg4[%c0_6, %c0_7], %25 {strides = array<i32>} : memref<8x256xbf16, #tpu.memory_space<vmem>>, vector<8x256xbf16>,
    return
  }
  func.func @transform_0(%arg0: i32) -> (i32, i32) {
    %c0_i32 = arith.constant 0 : i32
    %c0_i32_0 = arith.constant 0 : i32
    return %c0_i32, %arg0 : i32, i32
  }
  func.func @transform_1(%arg0: i32) -> (i32, i32) {
    %c0_i32 = arith.constant 0 : i32
    %c0_i32_0 = arith.constant 0 : i32
    %c0_i32_1 = arith.constant 0 : i32
    return %c0_i32, %c0_i32_0 : i32, i32
  }
  func.func @transform_2(%arg0: i32) -> (i32, i32) {
    %c0_i32 = arith.constant 0 : i32
    %c0_i32_0 = arith.constant 0 : i32
    %c0_i32_1 = arith.constant 0 : i32
    return %c0_i32, %c0_i32_0 : i32, i32
  }
  func.func @transform_3(%arg0: i32) -> (i32, i32) {
    %c0_i32 = arith.constant 0 : i32
    %c0_i32_0 = arith.constant 0 : i32
    return %c0_i32, %arg0 : i32, i32
  }
}

module attributes {stable_mosaic.version = 11 : i64} {
  func.func @_conv_relu_pool_kernel(%arg0: i32, %arg1: memref<32x128xbf16, #tpu.memory_space<vmem>>, %arg2: memref<64x128xbf16, #tpu.memory_space<vmem>>, %arg3: memref<16x1xf32, #tpu.memory_space<vmem>>, %arg4: memref<16x128xbf16, #tpu.memory_space<vmem>>) attributes {dimension_semantics = [#tpu.dimension_semantics<parallel>], iteration_bounds = array<i64: 1>, scalar_prefetch = 0 : i64, scratch_operands = 0 : i64, tpu.core_type = #tpu.core_type<tc>, window_params = [{transform_indices = @transform_0, window_bounds = array<i64: 32, 128>}, {pipeline_mode = #tpu.pipeline_mode<synchronous>, transform_indices = @transform_1, window_bounds = array<i64: 64, 128>}, {pipeline_mode = #tpu.pipeline_mode<synchronous>, transform_indices = @transform_2, window_bounds = array<i64: 16, 1>}, {transform_indices = @transform_3, window_bounds = array<i64: 16, 128>}]} {
    %c0 = arith.constant 0 : index
    %c0_0 = arith.constant 0 : index
    %0 = vector.load %arg1[%c0, %c0_0] : memref<32x128xbf16, #tpu.memory_space<vmem>>, vector<32x128xbf16>
    %1 = vector.extract_strided_slice %0 {offsets = [0, 1], sizes = [32, 127], strides = [1, 1]} : vector<32x128xbf16> to vector<32x127xbf16>
    %2 = vector.extract_strided_slice %0 {offsets = [0, 0], sizes = [32, 1], strides = [1, 1]} : vector<32x128xbf16> to vector<32x1xbf16>
    %3 = tpu.concatenate %1, %2 in 1 : vector<32x127xbf16>, vector<32x1xbf16> -> vector<32x128xbf16>
    %4 = vector.extract_strided_slice %0 {offsets = [0, 8], sizes = [32, 120], strides = [1, 1]} : vector<32x128xbf16> to vector<32x120xbf16>
    %5 = vector.extract_strided_slice %0 {offsets = [0, 0], sizes = [32, 8], strides = [1, 1]} : vector<32x128xbf16> to vector<32x8xbf16>
    %6 = tpu.concatenate %4, %5 in 1 : vector<32x120xbf16>, vector<32x8xbf16> -> vector<32x128xbf16>
    %7 = vector.extract_strided_slice %0 {offsets = [0, 9], sizes = [32, 119], strides = [1, 1]} : vector<32x128xbf16> to vector<32x119xbf16>
    %8 = vector.extract_strided_slice %0 {offsets = [0, 0], sizes = [32, 9], strides = [1, 1]} : vector<32x128xbf16> to vector<32x9xbf16>
    %9 = tpu.concatenate %7, %8 in 1 : vector<32x119xbf16>, vector<32x9xbf16> -> vector<32x128xbf16>
    %10 = tpu.concatenate %0, %3, %6, %9 in 0 : vector<32x128xbf16>, vector<32x128xbf16>, vector<32x128xbf16>, vector<32x128xbf16> -> vector<128x128xbf16>
    %c0_1 = arith.constant 0 : index
    %c0_2 = arith.constant 0 : index
    %11 = vector.load %arg2[%c0_1, %c0_2] : memref<64x128xbf16, #tpu.memory_space<vmem>>, vector<64x128xbf16>
    %cst = arith.constant dense<0.000000e+00> : vector<64x128xf32>
    %12 = tpu.matmul %11, %10, %cst {dimension_numbers = #tpu.dot_dimension_numbers<[1], [0], [0], [1], [0, 0, 1, 1], [], []>} : vector<64x128xbf16>, vector<128x128xbf16>, vector<64x128xf32> -> vector<64x128xf32>
    %13 = vector.extract_strided_slice %12 {offsets = [0, 0], sizes = [16, 128], strides = [1, 1]} : vector<64x128xf32> to vector<16x128xf32>
    %14 = vector.extract_strided_slice %12 {offsets = [16, 0], sizes = [16, 128], strides = [1, 1]} : vector<64x128xf32> to vector<16x128xf32>
    %15 = arith.maximumf %13, %14 : vector<16x128xf32>
    %16 = vector.extract_strided_slice %12 {offsets = [32, 0], sizes = [16, 128], strides = [1, 1]} : vector<64x128xf32> to vector<16x128xf32>
    %17 = vector.extract_strided_slice %12 {offsets = [48, 0], sizes = [16, 128], strides = [1, 1]} : vector<64x128xf32> to vector<16x128xf32>
    %18 = arith.maximumf %16, %17 : vector<16x128xf32>
    %19 = arith.maximumf %15, %18 : vector<16x128xf32>
    %c0_3 = arith.constant 0 : index
    %c0_4 = arith.constant 0 : index
    %20 = vector.load %arg3[%c0_3, %c0_4] : memref<16x1xf32, #tpu.memory_space<vmem>>, vector<16x1xf32>
    %21 = vector.broadcast %20 : vector<16x1xf32> to vector<16x128xf32>
    %22 = arith.addf %19, %21 : vector<16x128xf32>
    %cst_5 = arith.constant 0.000000e+00 : f32
    %23 = vector.broadcast %cst_5 : f32 to vector<16x128xf32>
    %24 = arith.maximumf %22, %23 : vector<16x128xf32>
    %25 = arith.truncf %24 : vector<16x128xf32> to vector<16x128xbf16>
    %c0_6 = arith.constant 0 : index
    %c0_7 = arith.constant 0 : index
    %26 = vector.load %arg4[%c0_6, %c0_7] : memref<16x128xbf16, #tpu.memory_space<vmem>>, vector<16x128xbf16>
    tpu.vector_store %arg4[%c0_6, %c0_7], %25 {strides = array<i32>} : memref<16x128xbf16, #tpu.memory_space<vmem>>, vector<16x128xbf16>,
    return
  }
  func.func @transform_0(%arg0: i32) -> (i32, i32) {
    %c0_i32 = arith.constant 0 : i32
    %c0_i32_0 = arith.constant 0 : i32
    return %c0_i32, %arg0 : i32, i32
  }
  func.func @transform_1(%arg0: i32) -> (i32, i32) {
    %c0_i32 = arith.constant 0 : i32
    %c0_i32_0 = arith.constant 0 : i32
    %c0_i32_1 = arith.constant 0 : i32
    return %c0_i32, %c0_i32_0 : i32, i32
  }
  func.func @transform_2(%arg0: i32) -> (i32, i32) {
    %c0_i32 = arith.constant 0 : i32
    %c0_i32_0 = arith.constant 0 : i32
    %c0_i32_1 = arith.constant 0 : i32
    return %c0_i32, %c0_i32_0 : i32, i32
  }
  func.func @transform_3(%arg0: i32) -> (i32, i32) {
    %c0_i32 = arith.constant 0 : i32
    %c0_i32_0 = arith.constant 0 : i32
    return %c0_i32, %arg0 : i32, i32
  }
}

module attributes {stable_mosaic.version = 11 : i64} {
  func.func @_mlp_kernel(%arg0: i32, %arg1: memref<2x1024xbf16, #tpu.memory_space<vmem>>, %arg2: memref<1024x128xbf16, #tpu.memory_space<vmem>>, %arg3: memref<1x128xf32, #tpu.memory_space<vmem>>, %arg4: memref<128x64xbf16, #tpu.memory_space<vmem>>, %arg5: memref<1x64xf32, #tpu.memory_space<vmem>>, %arg6: memref<64x128xbf16, #tpu.memory_space<vmem>>, %arg7: memref<1x128xf32, #tpu.memory_space<vmem>>, %arg8: memref<2x128xf32, #tpu.memory_space<vmem>>) attributes {dimension_semantics = [#tpu.dimension_semantics<parallel>], iteration_bounds = array<i64: 1>, scalar_prefetch = 0 : i64, scratch_operands = 0 : i64, tpu.core_type = #tpu.core_type<tc>, window_params = [{transform_indices = @transform_0, window_bounds = array<i64: 2, 1024>}, {pipeline_mode = #tpu.pipeline_mode<synchronous>, transform_indices = @transform_1, window_bounds = array<i64: 1024, 128>}, {pipeline_mode = #tpu.pipeline_mode<synchronous>, transform_indices = @transform_2, window_bounds = array<i64: 1, 128>}, {pipeline_mode = #tpu.pipeline_mode<synchronous>, transform_indices = @transform_3, window_bounds = array<i64: 128, 64>}, {pipeline_mode = #tpu.pipeline_mode<synchronous>, transform_indices = @transform_4, window_bounds = array<i64: 1, 64>}, {pipeline_mode = #tpu.pipeline_mode<synchronous>, transform_indices = @transform_5, window_bounds = array<i64: 64, 128>}, {pipeline_mode = #tpu.pipeline_mode<synchronous>, transform_indices = @transform_6, window_bounds = array<i64: 1, 128>}, {transform_indices = @transform_7, window_bounds = array<i64: 2, 128>}]} {
    %c0 = arith.constant 0 : index
    %c0_0 = arith.constant 0 : index
    %0 = vector.load %arg1[%c0, %c0_0] : memref<2x1024xbf16, #tpu.memory_space<vmem>>, vector<2x1024xbf16>
    %c0_1 = arith.constant 0 : index
    %c0_2 = arith.constant 0 : index
    %1 = vector.load %arg2[%c0_1, %c0_2] : memref<1024x128xbf16, #tpu.memory_space<vmem>>, vector<1024x128xbf16>
    %cst = arith.constant dense<0.000000e+00> : vector<2x128xf32>
    %2 = tpu.matmul %0, %1, %cst {dimension_numbers = #tpu.dot_dimension_numbers<[1], [0], [0], [1], [0, 0, 1, 1], [], []>} : vector<2x1024xbf16>, vector<1024x128xbf16>, vector<2x128xf32> -> vector<2x128xf32>
    %c0_3 = arith.constant 0 : index
    %c0_4 = arith.constant 0 : index
    %3 = vector.load %arg3[%c0_3, %c0_4] : memref<1x128xf32, #tpu.memory_space<vmem>>, vector<1x128xf32>
    %4 = vector.broadcast %3 : vector<1x128xf32> to vector<2x128xf32>
    %5 = arith.addf %2, %4 : vector<2x128xf32>
    %cst_5 = arith.constant 0.000000e+00 : f32
    %6 = vector.broadcast %cst_5 : f32 to vector<2x128xf32>
    %7 = arith.maximumf %5, %6 : vector<2x128xf32>
    %8 = arith.truncf %7 : vector<2x128xf32> to vector<2x128xbf16>
    %c0_6 = arith.constant 0 : index
    %c0_7 = arith.constant 0 : index
    %9 = vector.load %arg4[%c0_6, %c0_7] : memref<128x64xbf16, #tpu.memory_space<vmem>>, vector<128x64xbf16>
    %cst_8 = arith.constant dense<0.000000e+00> : vector<2x64xf32>
    %10 = tpu.matmul %8, %9, %cst_8 {dimension_numbers = #tpu.dot_dimension_numbers<[1], [0], [0], [1], [0, 0, 1, 1], [], []>} : vector<2x128xbf16>, vector<128x64xbf16>, vector<2x64xf32> -> vector<2x64xf32>
    %c0_9 = arith.constant 0 : index
    %c0_10 = arith.constant 0 : index
    %11 = vector.load %arg5[%c0_9, %c0_10] : memref<1x64xf32, #tpu.memory_space<vmem>>, vector<1x64xf32>
    %12 = vector.broadcast %11 : vector<1x64xf32> to vector<2x64xf32>
    %13 = arith.addf %10, %12 : vector<2x64xf32>
    %cst_11 = arith.constant 0.000000e+00 : f32
    %14 = vector.broadcast %cst_11 : f32 to vector<2x64xf32>
    %15 = arith.maximumf %13, %14 : vector<2x64xf32>
    %16 = arith.truncf %15 : vector<2x64xf32> to vector<2x64xbf16>
    %c0_12 = arith.constant 0 : index
    %c0_13 = arith.constant 0 : index
    %17 = vector.load %arg6[%c0_12, %c0_13] : memref<64x128xbf16, #tpu.memory_space<vmem>>, vector<64x128xbf16>
    %cst_14 = arith.constant dense<0.000000e+00> : vector<2x128xf32>
    %18 = tpu.matmul %16, %17, %cst_14 {dimension_numbers = #tpu.dot_dimension_numbers<[1], [0], [0], [1], [0, 0, 1, 1], [], []>} : vector<2x64xbf16>, vector<64x128xbf16>, vector<2x128xf32> -> vector<2x128xf32>
    %c0_15 = arith.constant 0 : index
    %c0_16 = arith.constant 0 : index
    %19 = vector.load %arg7[%c0_15, %c0_16] : memref<1x128xf32, #tpu.memory_space<vmem>>, vector<1x128xf32>
    %20 = vector.broadcast %19 : vector<1x128xf32> to vector<2x128xf32>
    %21 = arith.addf %18, %20 : vector<2x128xf32>
    %c0_17 = arith.constant 0 : index
    %c0_18 = arith.constant 0 : index
    %22 = vector.load %arg8[%c0_17, %c0_18] : memref<2x128xf32, #tpu.memory_space<vmem>>, vector<2x128xf32>
    tpu.vector_store %arg8[%c0_17, %c0_18], %21 {strides = array<i32>} : memref<2x128xf32, #tpu.memory_space<vmem>>, vector<2x128xf32>,
    return
  }
  func.func @transform_0(%arg0: i32) -> (i32, i32) {
    %c0_i32 = arith.constant 0 : i32
    %c0_i32_0 = arith.constant 0 : i32
    return %arg0, %c0_i32 : i32, i32
  }
  func.func @transform_1(%arg0: i32) -> (i32, i32) {
    %c0_i32 = arith.constant 0 : i32
    %c0_i32_0 = arith.constant 0 : i32
    %c0_i32_1 = arith.constant 0 : i32
    return %c0_i32, %c0_i32_0 : i32, i32
  }
  func.func @transform_2(%arg0: i32) -> (i32, i32) {
    %c0_i32 = arith.constant 0 : i32
    %c0_i32_0 = arith.constant 0 : i32
    %c0_i32_1 = arith.constant 0 : i32
    return %c0_i32, %c0_i32_0 : i32, i32
  }
  func.func @transform_3(%arg0: i32) -> (i32, i32) {
    %c0_i32 = arith.constant 0 : i32
    %c0_i32_0 = arith.constant 0 : i32
    %c0_i32_1 = arith.constant 0 : i32
    return %c0_i32, %c0_i32_0 : i32, i32
  }
  func.func @transform_4(%arg0: i32) -> (i32, i32) {
    %c0_i32 = arith.constant 0 : i32
    %c0_i32_0 = arith.constant 0 : i32
    %c0_i32_1 = arith.constant 0 : i32
    return %c0_i32, %c0_i32_0 : i32, i32
  }
  func.func @transform_5(%arg0: i32) -> (i32, i32) {
    %c0_i32 = arith.constant 0 : i32
    %c0_i32_0 = arith.constant 0 : i32
    %c0_i32_1 = arith.constant 0 : i32
    return %c0_i32, %c0_i32_0 : i32, i32
  }
  func.func @transform_6(%arg0: i32) -> (i32, i32) {
    %c0_i32 = arith.constant 0 : i32
    %c0_i32_0 = arith.constant 0 : i32
    %c0_i32_1 = arith.constant 0 : i32
    return %c0_i32, %c0_i32_0 : i32, i32
  }
  func.func @transform_7(%arg0: i32) -> (i32, i32) {
    %c0_i32 = arith.constant 0 : i32
    %c0_i32_0 = arith.constant 0 : i32
    return %arg0, %c0_i32 : i32, i32
  }
}

</mosaic_0001>

<bundles_post_ra>
// kernel: mnist_convo_forward.4
= control target key start
LH: loop header
LB: loop body
LE: loop exit
PB: predicated region body
PF: predicated region fallthrough
CT: control target
= control target key end

     0   :  { %s267_s14 = smov 127   ;;  %s268_s17 = smov 120   ;;  %v270_v4 = vmov 0   ;;  %s318_s0 = inlined_call_operand.vmem [shape: bf16[32,128], index: 0, kind: input, shape index: {}]   ;;  %s319_s1 = inlined_call_operand.vmem [shape: bf16[64,128], index: 1, kind: input, shape index: {}]   ;;  %s320_s2 = inlined_call_operand.vmem [shape: f32[16,1], index: 2, kind: input, shape index: {}]   ;;  %s321_s3 = inlined_call_operand.vmem [shape: bf16[16,128], index: 3, kind: output, shape index: {}]  }
   0x1   :  { %v261_v0 = vld [vmem:[%s318_s0] sm:$0xff]   ;;  %v262_v1 = vld [vmem:[%s318_s0 + $0x8] sm:$0xff]   ;;  %s269_s18 = smov 119   ;;  %v264_v3 = vld [vmem:[%s319_s1 + $0x10] sm:$0xff]   ;;  %259 = vset.pattern.permute.xlu0 %v270_v4  ;;  %260 = vset.pattern.permute.xlu1 %v270_v4 }
   0x2   :  { %29 = vrot.lane.b32.xlu0 %v261_v0, %s267_s14  ;;  %37 = vrot.lane.b32.xlu1 %v261_v0, %s268_s17  ;;  %v263_v2 = vld [vmem:[%s319_s1] sm:$0xff]   ;;  %v159_v6 = vld [vmem:[%s320_s2 + $0x8] sm:$0xff] }
   0x3   :  { %215 = vmatprep.subr.bf16.mxu0 %v261_v0  ;;  %239 = vmatprep.subr.bf16.mxu1 %v261_v0  ;;  %v158_v5 = vld [vmem:[%s320_s2] sm:$0xff]  ;;  %v265_v13 = vld [vmem:[%s319_s1 + $0x8] sm:$0xff]   ;;  %v266_v14 = vld [vmem:[%s319_s1 + $0x18] sm:$0xff]  }
   0x4   :  { %216 = vmatpush3.bf16.msra.mxu0 %v261_v0  ;;  %247 = vmatpush3.bf16.msra.mxu1 %v261_v0 }
   0x5   :  { %217 = vmatprep.subr.bf16.mxu0 %v262_v1  ;;  %240 = vmatprep.subr.bf16.mxu1 %v262_v1 }
   0x6   :  { %31 = vrot.lane.b32.xlu0 %v262_v1, %s267_s14  ;;  %39 = vrot.lane.b32.xlu1 %v262_v1, %s268_s17 }
   0x7   :  { %231 = vmatprep.mubr.bf16.mxu0 %v263_v2  ;;  %235 = vmatprep.mubr.bf16.mxu1 %v264_v3 }
   0x8   :  { %218 = vmatpush3.bf16.msra.mxu0 %v262_v1  ;;  %248 = vmatpush3.bf16.msra.mxu1 %v262_v1 }
   0xa   :  { %45 = vrot.lane.b32.xlu0 %v261_v0, %s269_s18  ;;  %47 = vrot.lane.b32.xlu1 %v262_v1, %s269_s18 }
   0xe   :  { %162 = vperm.xlu0 %259, %v158_v5   ;;  %167 = vperm.xlu1 %260, %v159_v6  }
  0x74   :  { %v30_v7 = vpop.permute.xlu0 %29  ;;  %v38_v8 = vpop.permute.xlu1 %37 }
  0x75   :  { %219 = vmatprep.subr.bf16.mxu0 %v30_v7  ;;  %241 = vmatprep.subr.bf16.mxu1 %v30_v7 }
  0x76   :  { %220 = vmatpush3.bf16.msra.mxu0 %v30_v7  ;;  %249 = vmatpush3.bf16.msra.mxu1 %v30_v7 }
  0x78   :  { %v32_v9 = vpop.permute.xlu0 %31  ;;  %v40_v10 = vpop.permute.xlu1 %39 }
  0x79   :  { %221 = vmatprep.subr.bf16.mxu0 %v32_v9  ;;  %242 = vmatprep.subr.bf16.mxu1 %v32_v9 }
  0x7a   :  { %222 = vmatpush3.bf16.msra.mxu0 %v32_v9  ;;  %250 = vmatpush3.bf16.msra.mxu1 %v32_v9 }
  0x7b   :  { %223 = vmatprep.subr.bf16.mxu0 %v38_v8  ;;  %243 = vmatprep.subr.bf16.mxu1 %v38_v8 }
  0x7c   :  { %v46_v11 = vpop.permute.xlu0 %45  ;;  %v48_v12 = vpop.permute.xlu1 %47 }
  0x7e   :  { %224 = vmatpush3.bf16.msra.mxu0 %v38_v8  ;;  %251 = vmatpush3.bf16.msra.mxu1 %v38_v8 }
  0x7f   :  { %225 = vmatprep.subr.bf16.mxu0 %v40_v10  ;;  %244 = vmatprep.subr.bf16.mxu1 %v40_v10 }
  0x82   :  { %226 = vmatpush3.bf16.msra.mxu0 %v40_v10  ;;  %252 = vmatpush3.bf16.msra.mxu1 %v40_v10 }
  0x83   :  { %227 = vmatprep.subr.bf16.mxu0 %v46_v11  ;;  %245 = vmatprep.subr.bf16.mxu1 %v46_v11 }
  0x86   :  { %228 = vmatpush3.bf16.msra.mxu0 %v46_v11  ;;  %253 = vmatpush3.bf16.msra.mxu1 %v46_v11 }
  0x87   :  { %229 = vmatprep.subr.bf16.mxu0 %v48_v12  ;;  %246 = vmatprep.subr.bf16.mxu1 %v48_v12 }
  0x8a   :  { %230 = vmatpush3.bf16.msra.mxu0 %v48_v12  ;;  %254 = vmatpush3.bf16.msra.mxu1 %v48_v12 }
  0x8d   :  { %232 = vmatmul.mubr.bf16.vlgmr.msra.gmra.mrb[0].mxu0 %v265_v13  ;;  %236 = vmatmul.mubr.bf16.vlgmr.msra.gmra.mrb[0].mxu1 %v266_v14  ;;  %v163_v15 = vpop.permute.xlu0 %162  ;;  %v168_v29 = vpop.permute.xlu1 %167 }
 0x160   :  { %v233_v16 = vpop.f32.mrb[0].mxu0  ;;  %v237_v17 = vpop.f32.mrb[0].mxu1 }
 0x161   :  { %v121_v18 = vpop.f32.mrb[1].mxu0  ;;  %v137_v19 = vpop.f32.mrb[1].mxu1 }
 0x162   :  { %v152_v20 = vmax.f32 %v121_v18, %v233_v16  ;;  %v154_v21 = vmax.f32 %v137_v19, %v237_v17  ;;  %v234_v22 = vpop.f32.mrb[2].mxu0  ;;  %v238_v23 = vpop.f32.mrb[2].mxu1 }
 0x163   :  { %v124_v24 = vpop.f32.mrb[3].mxu0  ;;  %v140_v25 = vpop.f32.mrb[3].mxu1 }
 0x164   :  { %v153_v26 = vmax.f32 %v124_v24, %v234_v22  ;;  %v155_v27 = vmax.f32 %v140_v25, %v238_v23  ;;  %v156_v28 = vmax.f32 %v152_v20, %v154_v21 }
 0x166   :  { %v170_v30 = vadd.f32 %v163_v15, %v156_v28  ;;  %v157_v31 = vmax.f32 %v153_v26, %v155_v27 }
 0x168   :  { %v171_v32 = vadd.f32 %v168_v29, %v157_v31  ;;  %v172_v33 = vmax.f32 %v170_v30, 0.0 }
 0x16a   :  { %v173_v34 = vmax.f32 %v171_v32, 0.0 }
 0x16c   :  { %v201_v35 = vpack.c.bf16 %v173_v34, %v172_v33 }
 0x16e   :  { %202 = vst [vmem:[%s321_s3] sm:$0xff] %v201_v35  }

// kernel: mnist_convo_forward.3
= control target key start
LH: loop header
LB: loop body
LE: loop exit
PB: predicated region body
PF: predicated region fallthrough
CT: control target
= control target key end

     0   :  { %s465_s12 = smov 0   ;;  %s495_s0 = inlined_call_operand.vmem [shape: bf16[4,512], index: 0, kind: input, shape index: {}]   ;;  %s496_s1 = inlined_call_operand.vmem [shape: bf16[32,16], index: 1, kind: input, shape index: {}]   ;;  %s497_s2 = inlined_call_operand.vmem [shape: f32[8,1], index: 2, kind: input, shape index: {}]   ;;  %s498_s3 = inlined_call_operand.vmem [shape: bf16[8,512], index: 3, kind: output, shape index: {}]  }
   0x1 LB: > { %s398_s13 = sadd.s32 4294967295, %s439_s12   ;;  %p402_p0 = scmp.ge.s32.totalorder %s439_s12, 1  ;;  %s439_s12 = sphi %s465_s12, %s13_s12  }
   0x2   : > { %p138_p1 = scmp.lt.s32.totalorder %s439_s12, 3 }
   0x4   : > { %p139_p2 = pnand %p402_p0, %p138_p1 }
   0x5   : > { %s403_s14 = sshll.u32 (!%p139_p2), %s398_s13, 1  ;;  %s441_s19 = smov (!%p139_p2), 112   ;;  %v443_v2 = vmov (!%p139_p2), 0   ;;  %v323_v3 = vld [vmem:[%s497_s2] sm:$0xff] (!%p139_p2)  ;;  %vm199_vm0 = vcmask (!%p139_p2), 916480   ;;  %vm189_vm1 = vcmask (!%p139_p2), 1039360  }
   0x6   : > { %142 = sbr.rel (%p139_p2) target bundleno = 374 (0x176), region = 32  ;;  %p163_p3 = scmp.lt.s32.totalorder (!%p139_p2), %s403_s14, 3  ;;  %296 = vmatprep.mubr.bf16.mxu0 (!%p139_p2), %v443_v2  ;;  %306 = vmatprep.mubr.bf16.mxu1 (!%p139_p2), %v443_v2  ;;  %vm224_vm2 = vcmask (!%p139_p2), 1041408   ;;  %vm209_vm3 = vcmask (!%p139_p2), 908288   ;;  %vm231_vm4 = vcmask (!%p139_p2), 1043456   ;;  %vm236_vm5 = vcmask (!%p139_p2), 1045504  }
   0x7   : > { %s442_s20 = smov (!%p139_p2), 127   ;;  %430 = vset.pattern.permute.xlu0 (!%p139_p2), %v443_v2  ;;  %s444_s21 = smov (!%p139_p2), 111   ;;  %v431_v28 = vld [vmem:[%s496_s1] sm:$0xff] (!%p139_p2)   ;;  %v432_v29 = vld [vmem:[%s496_s1 + $0x8] sm:$0xff] (!%p139_p2)   ;;  %vm257_vm6 = vcmask (!%p139_p2), 130048  }
   0xd   : > { %s500_s14 = smov (!%p163_p3, %s403_s14), 3 }
   0xe   : > { %s404_s15 = sshll.u32 %s500_s14, 1  ;;  %s406_s28 = sshll.u32 %s500_s14, 2 }
   0xf   : > { %s166_s18 = scalar_lea.vmem %s495_s0, %s404_s15  ;;  %s172_s4 = scalar_lea.vmem %s498_s3, %s406_s28 }
  0x10   : > { %v407_v0 = vld.sshfl [vmem:[%s166_s18] sm:$0x33 pattern:$0x76325410] }
  0x11   : > { %195 = vrot.lane.b32.xlu1 %v407_v0, %s441_s19  ;;  %185 = vrot.lane.b32.xlu0 %v407_v0, %s442_s20  ;;  %v184_v1 = vcombine.high %v407_v0, %v407_v0 }
  0x15   : > { %197 = vrot.lane.b32.xlu1 %v184_v1, %s441_s19  ;;  %187 = vrot.lane.b32.xlu0 %v184_v1, %s442_s20 }
  0x19   : > { %207 = vrot.lane.b32.xlu1 %v184_v1, %s444_s21  ;;  %205 = vrot.lane.b32.xlu0 %v407_v0, %s444_s21 }
  0x1d   : > { %326 = vperm.xlu0 %430, %v323_v3  }
  0x83   : > { %v196_v4 = vpop.permute.xlu1 %195  ;;  %v186_v5 = vpop.permute.xlu0 %185 }
  0x87   : > { %v198_v6 = vpop.permute.xlu1 %197  ;;  %v188_v7 = vpop.permute.xlu0 %187 }
  0x88   : > { %v200_v8 = vsel %vm199_vm0, %v196_v4, %v198_v6  ;;  %v204_v9 = vsel %vm199_vm0, %v198_v6, %v196_v4  ;;  %v190_v10 = vsel %vm189_vm1, %v186_v5, %v188_v7  ;;  %v194_v11 = vsel %vm189_vm1, %v188_v7, %v186_v5 }
  0x89   : > { %v216_v12 = vrot.slane %v190_v10, 6  ;;  %v217_v13 = vrot.slane %v194_v11, 6  ;;  %v219_v14 = vrot.slane %v200_v8, 4  ;;  %v220_v15 = vrot.slane %v204_v9, 4 }
  0x8b   : > { %v208_v16 = vpop.permute.xlu1 %207  ;;  %v206_v17 = vpop.permute.xlu0 %205  ;;  %v230_v18 = vsel %vm224_vm2, %v184_v1, %v217_v13  ;;  %v227_v19 = vsel %vm224_vm2, %v407_v0, %v216_v12 }
  0x8c   : > { %v210_v20 = vsel %vm209_vm3, %v206_v17, %v208_v16  ;;  %v214_v21 = vsel %vm209_vm3, %v208_v16, %v206_v17  ;;  %v235_v24 = vsel %vm231_vm4, %v230_v18, %v220_v15  ;;  %v233_v25 = vsel %vm231_vm4, %v227_v19, %v219_v14 }
  0x8d   : > { %v222_v22 = vrot.slane %v210_v20, 2  ;;  %v223_v23 = vrot.slane %v214_v21, 2 }
  0x8f   : > { %v241_v26 = vsel %vm236_vm5, %v235_v24, %v223_v23  ;;  %v238_v27 = vsel %vm236_vm5, %v233_v25, %v222_v22 }
  0x90   : > { %264 = vmatprep.subr.bf16.mxu0 %v241_v26  ;;  %416 = vmatprep.subr.bf16.mxu1 %v241_v26 }
  0x91   : > { %265 = vmatpush1.bf16.msra.mxu0 %v238_v27  ;;  %417 = vmatpush1.bf16.msra.mxu1 %v238_v27 }
  0x94   : > { %410 = vmatmul.mubr.msk.bf16.vlgmr.msra.gmra.mrb[0].mxu0 %vm257_vm6, %v431_v28  ;;  %411 = vmatmul.mubr.msk.bf16.vlgmr.msra.gmra.mrb[0].mxu1 %vm257_vm6, %v432_v29 }
  0x9c   : > { %v327_v42 = vpop.permute.xlu0 %326 }
 0x167   : > { %v298_v30 = vpop.f32.mrb[0].mxu0  ;;  %v308_v31 = vpop.f32.mrb[0].mxu1 }
 0x168   : > { %v300_v32 = vpop.f32.mrb[1].mxu0  ;;  %v310_v33 = vpop.f32.mrb[1].mxu1 }
 0x169   : > { %v302_v34 = vpop.f32.mrb[2].mxu0  ;;  %v312_v35 = vpop.f32.mrb[2].mxu1 }
 0x16a   : > { %v317_v36 = vmax.f32 %v298_v30, %v302_v34  ;;  %v319_v37 = vmax.f32 %v308_v31, %v312_v35  ;;  %v304_v38 = vpop.f32.mrb[3].mxu0  ;;  %v314_v39 = vpop.f32.mrb[3].mxu1 }
 0x16b   : > { %v318_v40 = vmax.f32 %v300_v32, %v304_v38  ;;  %v320_v41 = vmax.f32 %v310_v33, %v314_v39 }
 0x16c   : > { %v321_v43 = vmax.f32 %v317_v36, %v319_v37 }
 0x16d   : > { %v322_v44 = vmax.f32 %v318_v40, %v320_v41 }
 0x16e   : > { %v329_v45 = vadd.f32 %v327_v42, %v321_v43 }
 0x16f   : > { %v330_v46 = vadd.f32 %v327_v42, %v322_v44 }
 0x170   : > { %v331_v47 = vmax.f32 %v329_v45, 0.0 }
 0x171   : > { %v332_v48 = vmax.f32 %v330_v46, 0.0 }
 0x173   : > { %v415_v49 = vpack.c.bf16 %v332_v48, %v331_v47 }
 0x175   : > { %341 = vst [vmem:[%s172_s4] sm:$0xff] %v415_v49 }
 0x176 PF: > { %s13_s12 = sadd.s32 1, %s439_s12  }
 0x177   : > { %p10_p4 = scmp.ge.s32.totalorder %s13_s12, 4  }
 0x179   :  { %12 = sbr.rel (!%p10_p4) target bundleno = 1 (0x1), region = 62 }

// kernel: mnist_convo_forward.5
= control target key start
LH: loop header
LB: loop body
LE: loop exit
PB: predicated region body
PF: predicated region fallthrough
CT: control target
= control target key end

     0   :  { %v169_v28 = vlaneseq  ;;  %v1298_v36 = vmov 1966171168   ;;  %s1621_s0 = inlined_call_operand.vmem [shape: bf16[2,1024], index: 0, kind: input, shape index: {}]   ;;  %s1622_s1 = inlined_call_operand.vmem [shape: bf16[1024,128], index: 1, kind: input, shape index: {}]   ;;  %s1623_s2 = inlined_call_operand.vmem [shape: f32[1,128], index: 2, kind: input, shape index: {}]   ;;  %s1624_s3 = inlined_call_operand.vmem [shape: bf16[128,64], index: 3, kind: input, shape index: {}]   ;;  %s1625_s4 = inlined_call_operand.vmem [shape: f32[1,64], index: 4, kind: input, shape index: {}]   ;;  %s1626_s5 = inlined_call_operand.vmem [shape: bf16[64,128], index: 5, kind: input, shape index: {}]   ;;  %s1627_s6 = inlined_call_operand.vmem [shape: f32[1,128], index: 6, kind: input, shape index: {}]   ;;  %s1628_s7 = inlined_call_operand.hbm [shape: f32[2,128], index: 7, kind: output, shape index: {}]  }
   0x1   :  { %v1197_v0 = vld [vmem:[%s1622_s1 + $0x40] sm:$0xff]   ;;  %v1201_v4 = vld [vmem:[%s1622_s1 + $0x48] sm:$0xff]   ;;  %v1205_v8 = vld [vmem:[%s1622_s1 + $0x50] sm:$0xff]   ;;  %v167_v37 = vunpack.c.l.s4 %v1298_v36 }
   0x2   :  { %v1198_v1 = vld [vmem:[%s1622_s1 + $0xc0] sm:$0xff]   ;;  %1059 = vmatprep.subr.bf16.mxu0 %v1197_v0  ;;  %v1202_v5 = vld [vmem:[%s1622_s1 + $0xc8] sm:$0xff]   ;;  %v1206_v9 = vld [vmem:[%s1622_s1 + $0xd0] sm:$0xff]   ;;  %v170_v33 = vshrl.u32 %v169_v28, 7 }
   0x3   :  { %v1199_v2 = vld [vmem:[%s1622_s1] sm:$0xff]   ;;  %1081 = vmatprep.subr.bf16.mxu1 %v1198_v1  ;;  %v1203_v6 = vld [vmem:[%s1622_s1 + $0x8] sm:$0xff]   ;;  %v1207_v10 = vld [vmem:[%s1622_s1 + $0x10] sm:$0xff]   ;;  %v168_v40 = vunpack.c.0.s8 %v167_v37 }
   0x4   :  { %v1200_v3 = vld [vmem:[%s1622_s1 + $0x80] sm:$0xff]   ;;  %1060 = vmatpush3.bf16.msra.mxu0 %v1199_v2  ;;  %v1204_v7 = vld [vmem:[%s1622_s1 + $0x88] sm:$0xff]   ;;  %v1208_v11 = vld [vmem:[%s1622_s1 + $0x90] sm:$0xff]  }
   0x5   :  { %1082 = vmatpush3.bf16.msra.mxu1 %v1200_v3  ;;  %1061 = vmatprep.subr.bf16.mxu0 %v1201_v4  ;;  %v1209_v12 = vld [vmem:[%s1622_s1 + $0x58] sm:$0xff]   ;;  %v1213_v16 = vld [vmem:[%s1622_s1 + $0x60] sm:$0xff]   ;;  %v1217_v20 = vld [vmem:[%s1622_s1 + $0x68] sm:$0xff]   ;;  %v1447_v41 = vsub.s32 %v168_v40, %v170_v33 }
   0x6   :  { %1083 = vmatprep.subr.bf16.mxu1 %v1202_v5  ;;  %v1210_v13 = vld [vmem:[%s1622_s1 + $0xd8] sm:$0xff]   ;;  %v1214_v17 = vld [vmem:[%s1622_s1 + $0xe0] sm:$0xff]   ;;  %v1218_v21 = vld [vmem:[%s1622_s1 + $0xe8] sm:$0xff]  }
   0x7   :  { %v1211_v14 = vld [vmem:[%s1622_s1 + $0x18] sm:$0xff]   ;;  %v1215_v18 = vld [vmem:[%s1622_s1 + $0x20] sm:$0xff]   ;;  %v1219_v22 = vld [vmem:[%s1622_s1 + $0x28] sm:$0xff]  }
   0x8   :  { %1062 = vmatpush3.bf16.msra.mxu0 %v1203_v6  ;;  %v1212_v15 = vld [vmem:[%s1622_s1 + $0x98] sm:$0xff]   ;;  %v1216_v19 = vld [vmem:[%s1622_s1 + $0xa0] sm:$0xff]   ;;  %v1220_v23 = vld [vmem:[%s1622_s1 + $0xa8] sm:$0xff]  }
   0x9   :  { %1084 = vmatpush3.bf16.msra.mxu1 %v1204_v7  ;;  %1063 = vmatprep.subr.bf16.mxu0 %v1205_v8  ;;  %v1221_v24 = vld [vmem:[%s1622_s1 + $0x70] sm:$0xff]   ;;  %v1225_v29 = vld [vmem:[%s1622_s1 + $0x78] sm:$0xff]   ;;  %v28_v34 = vld [vmem:[%s1621_s0] sm:$0xff] }
   0xa   :  { %1085 = vmatprep.subr.bf16.mxu1 %v1206_v9  ;;  %v1222_v25 = vld [vmem:[%s1622_s1 + $0xf0] sm:$0xff]   ;;  %v1226_v30 = vld [vmem:[%s1622_s1 + $0xf8] sm:$0xff]   ;;  %v1230_v35 = vld [vmem:[%s1622_s1 + $0x140] sm:$0xff]   ;;  %v165_v39 = vcombine.high %v28_v34, %v28_v34  ;;  %v172_v42 = vrot.slane %v28_v34, %v1447_v41 }
   0xb   :  { %v1223_v26 = vld [vmem:[%s1622_s1 + $0x30] sm:$0xff]   ;;  %v1227_v31 = vld [vmem:[%s1622_s1 + $0x38] sm:$0xff]   ;;  %v1231_v38 = vld [vmem:[%s1622_s1 + $0x1c0] sm:$0xff]  }
   0xc   :  { %1064 = vmatpush3.bf16.msra.mxu0 %v1207_v10  ;;  %v1224_v27 = vld [vmem:[%s1622_s1 + $0xb0] sm:$0xff]   ;;  %v1228_v32 = vld [vmem:[%s1622_s1 + $0xb8] sm:$0xff]   ;;  %v1451_v43 = vrot.slane %v165_v39, %v1447_v41  ;;  %v180_v44 = vcombine.high %v172_v42, %v172_v42  ;;  %v188_v45 = vrot.slane %v172_v42, %v1447_v41  ;;  %v1232_v47 = vld [vmem:[%s1622_s1 + $0x100] sm:$0xff]  }
   0xd   :  { %1086 = vmatpush3.bf16.msra.mxu1 %v1208_v11  ;;  %1065 = vmatprep.subr.bf16.mxu0 %v1209_v12  ;;  %v1233_v49 = vld [vmem:[%s1622_s1 + $0x180] sm:$0xff]   ;;  %v1234_v52 = vld [vmem:[%s1622_s1 + $0x148] sm:$0xff]   ;;  %v1238_v58 = vld [vmem:[%s1622_s1 + $0x150] sm:$0xff]  }
   0xe   :  { %1087 = vmatprep.subr.bf16.mxu1 %v1210_v13  ;;  %v181_v46 = vcombine.high %v1451_v43, %v1451_v43  ;;  %v202_v48 = vrot.slane %v180_v44, %v1447_v41  ;;  %v210_v51 = vcombine.high %v188_v45, %v188_v45  ;;  %v1235_v54 = vld [vmem:[%s1622_s1 + $0x1c8] sm:$0xff]   ;;  %v1239_v59 = vld [vmem:[%s1622_s1 + $0x1d0] sm:$0xff]   ;;  %v1242_v62 = vld [vmem:[%s1622_s1 + $0x158] sm:$0xff]  }
   0xf   :  { %v1236_v55 = vld [vmem:[%s1622_s1 + $0x108] sm:$0xff]   ;;  %v1240_v60 = vld [vmem:[%s1622_s1 + $0x110] sm:$0xff]   ;;  %v1243_v63 = vld [vmem:[%s1622_s1 + $0x1d8] sm:$0xff]  }
  0x10   :  { %1066 = vmatpush3.bf16.msra.mxu0 %v1211_v14  ;;  %v209_v50 = vrot.slane %v181_v46, %v1447_v41  ;;  %638 = vmatprep.mubr.bf16.mxu0 %v202_v48  ;;  %v212_v53 = vcombine.high %v202_v48, %v202_v48  ;;  %v1237_v57 = vld [vmem:[%s1622_s1 + $0x188] sm:$0xff]   ;;  %v1241_v61 = vld [vmem:[%s1622_s1 + $0x190] sm:$0xff]   ;;  %v1244_v0 = vld [vmem:[%s1622_s1 + $0x118] sm:$0xff]  }
  0x11   :  { %1088 = vmatpush3.bf16.msra.mxu1 %v1212_v15  ;;  %1067 = vmatprep.subr.bf16.mxu0 %v1213_v16  ;;  %v1245_v1 = vld [vmem:[%s1622_s1 + $0x198] sm:$0xff]   ;;  %v1246_v2 = vld [vmem:[%s1622_s1 + $0x160] sm:$0xff]   ;;  %v1250_v6 = vld [vmem:[%s1622_s1 + $0x168] sm:$0xff]  }
  0x12   :  { %1089 = vmatprep.subr.bf16.mxu1 %v1214_v17  ;;  %v213_v56 = vcombine.high %v209_v50, %v209_v50  ;;  %678 = vmatprep.mubr.bf16.mxu1 %v212_v53  ;;  %v1247_v3 = vld [vmem:[%s1622_s1 + $0x1e0] sm:$0xff]   ;;  %v1251_v7 = vld [vmem:[%s1622_s1 + $0x1e8] sm:$0xff]   ;;  %v1254_v10 = vld [vmem:[%s1622_s1 + $0x170] sm:$0xff]   ;;  %v195_v17 = vrot.slane %v1451_v43, %v1447_v41 }
  0x13   :  { %v1248_v4 = vld [vmem:[%s1622_s1 + $0x120] sm:$0xff]   ;;  %v1252_v8 = vld [vmem:[%s1622_s1 + $0x128] sm:$0xff]   ;;  %v1255_v11 = vld [vmem:[%s1622_s1 + $0x1f0] sm:$0xff]  }
  0x14   :  { %1068 = vmatpush3.bf16.msra.mxu0 %v1215_v18  ;;  %v1249_v5 = vld [vmem:[%s1622_s1 + $0x1a0] sm:$0xff]   ;;  %v1253_v9 = vld [vmem:[%s1622_s1 + $0x1a8] sm:$0xff]   ;;  %v1256_v12 = vld [vmem:[%s1622_s1 + $0x130] sm:$0xff]  }
  0x15   :  { %1090 = vmatpush3.bf16.msra.mxu1 %v1216_v19  ;;  %1069 = vmatprep.subr.bf16.mxu0 %v1217_v20  ;;  %v1258_v13 = vld [vmem:[%s1622_s1 + $0x178] sm:$0xff]   ;;  %v1257_v14 = vld [vmem:[%s1622_s1 + $0x1b0] sm:$0xff]  }
  0x16   :  { %1091 = vmatprep.subr.bf16.mxu1 %v1218_v21  ;;  %v1259_v15 = vld [vmem:[%s1622_s1 + $0x1f8] sm:$0xff]  }
  0x17   :  { %v1260_v16 = vld [vmem:[%s1622_s1 + $0x138] sm:$0xff]  }
  0x18   :  { %1070 = vmatpush3.bf16.msra.mxu0 %v1219_v22 }
  0x19   :  { %1092 = vmatpush3.bf16.msra.mxu1 %v1220_v23  ;;  %1071 = vmatprep.subr.bf16.mxu0 %v1221_v24 }
  0x1a   :  { %1093 = vmatprep.subr.bf16.mxu1 %v1222_v25 }
  0x1c   :  { %1072 = vmatpush3.bf16.msra.mxu0 %v1223_v26 }
  0x1d   :  { %1094 = vmatpush3.bf16.msra.mxu1 %v1224_v27  ;;  %1073 = vmatprep.subr.bf16.mxu0 %v1225_v29 }
  0x1e   :  { %1095 = vmatprep.subr.bf16.mxu1 %v1226_v30 }
  0x20   :  { %1074 = vmatpush3.bf16.msra.mxu0 %v1227_v31 }
  0x21   :  { %1096 = vmatpush3.bf16.msra.mxu1 %v1228_v32  ;;  %1103 = vmatprep.subr.bf16.mxu0 %v1230_v35 }
  0x22   :  { %1125 = vmatprep.subr.bf16.mxu1 %v1231_v38 }
  0x23   :  { %639 = vmatmul.mubr.bf16.vlgmr.msra.gmra.mrb[0].mxu0 %v188_v45 }
  0x24   :  { %1104 = vmatpush3.bf16.msra.mxu0 %v1232_v47  ;;  %679 = vmatmul.mubr.bf16.vlgmr.msra.gmra.mrb[0].mxu1 %v210_v51 }
  0x25   :  { %1105 = vmatprep.subr.bf16.mxu0 %v1234_v52  ;;  %1126 = vmatpush3.bf16.msra.mxu1 %v1233_v49 }
  0x26   :  { %718 = vmatprep.mubr.bf16.mxu0 %v209_v50  ;;  %1127 = vmatprep.subr.bf16.mxu1 %v1235_v54 }
  0x27   :  { %758 = vmatprep.mubr.bf16.mxu1 %v213_v56 }
  0x28   :  { %1106 = vmatpush3.bf16.msra.mxu0 %v1236_v55 }
  0x29   :  { %1107 = vmatprep.subr.bf16.mxu0 %v1238_v58  ;;  %1128 = vmatpush3.bf16.msra.mxu1 %v1237_v57 }
  0x2a   :  { %1129 = vmatprep.subr.bf16.mxu1 %v1239_v59 }
  0x2c   :  { %1108 = vmatpush3.bf16.msra.mxu0 %v1240_v60 }
  0x2d   :  { %1109 = vmatprep.subr.bf16.mxu0 %v1242_v62  ;;  %1130 = vmatpush3.bf16.msra.mxu1 %v1241_v61 }
  0x2e   :  { %1131 = vmatprep.subr.bf16.mxu1 %v1243_v63 }
  0x30   :  { %1110 = vmatpush3.bf16.msra.mxu0 %v1244_v0 }
  0x31   :  { %1111 = vmatprep.subr.bf16.mxu0 %v1246_v2  ;;  %1132 = vmatpush3.bf16.msra.mxu1 %v1245_v1 }
  0x32   :  { %1133 = vmatprep.subr.bf16.mxu1 %v1247_v3 }
  0x34   :  { %1112 = vmatpush3.bf16.msra.mxu0 %v1248_v4 }
  0x35   :  { %1113 = vmatprep.subr.bf16.mxu0 %v1250_v6  ;;  %1134 = vmatpush3.bf16.msra.mxu1 %v1249_v5 }
  0x36   :  { %1135 = vmatprep.subr.bf16.mxu1 %v1251_v7 }
  0x38   :  { %1114 = vmatpush3.bf16.msra.mxu0 %v1252_v8 }
  0x39   :  { %1115 = vmatprep.subr.bf16.mxu0 %v1254_v10  ;;  %1136 = vmatpush3.bf16.msra.mxu1 %v1253_v9 }
  0x3a   :  { %1137 = vmatprep.subr.bf16.mxu1 %v1255_v11 }
  0x3c   :  { %1116 = vmatpush3.bf16.msra.mxu0 %v1256_v12 }
  0x3d   :  { %1117 = vmatprep.subr.bf16.mxu0 %v1258_v13 }
  0x3e   :  { %12 = vsyncpa [#allocation3], 0  ;;  %1138 = vmatpush3.bf16.msra.mxu1 %v1257_v14  ;;  %v1261_v18 = vld [vmem:[%s1622_s1 + $0x1b8] sm:$0xff]   ;;  %v211_v19 = vcombine.high %v195_v17, %v195_v17  ;;  %v1262_v20 = vld [vmem:[%s1624_s3] sm:$0xff]   ;;  %v1299_v21 = vmov 0.0   ;;  %vm1300_vm0 = vmmov 0  }
  0x3f   :  { %1139 = vmatprep.subr.bf16.mxu1 %v1259_v15  ;;  %v1263_v22 = vld [vmem:[%s1624_s3 + $0x8] sm:$0xff]   ;;  %v1264_v23 = vld [vmem:[%s1624_s3 + $0x10] sm:$0xff]   ;;  %v1265_v24 = vld [vmem:[%s1624_s3 + $0x18] sm:$0xff]   ;;  %vm920_vm1 = vcmask 523264   ;;  %s1301_s16 = smov [#allocation2]  }
  0x40   :  { %1118 = vmatpush3.bf16.msra.mxu0 %v1260_v16  ;;  %v1266_v25 = vld [vmem:[%s1624_s3 + $0x20] sm:$0xff]   ;;  %v1267_v26 = vld [vmem:[%s1624_s3 + $0x28] sm:$0xff]   ;;  %v1268_v27 = vld [vmem:[%s1624_s3 + $0x30] sm:$0xff]  }
  0x41   :  { %1161 = vmatprep.subr.bf16.mxu0 %v1299_v21  ;;  %v1269_v28 = vld [vmem:[%s1624_s3 + $0x38] sm:$0xff]   ;;  %v1270_v29 = vld [vmem:[%s1626_s5] sm:$0xff]   ;;  %v1271_v30 = vld [vmem:[%s1626_s5 + $0x8] sm:$0xff]  }
  0x42   :  { %1140 = vmatpush3.bf16.msra.mxu1 %v1261_v18  ;;  %v979_v32 = vld [vmem:[%s1623_s2] ss:$0 sm:$0xff]  ;;  %v1272_v58 = vld [vmem:[%s1626_s5 + $0x10] sm:$0xff]   ;;  %v1273_v59 = vld [vmem:[%s1626_s5 + $0x18] sm:$0xff]   ;;  %s971_s5 = sshll.u32 %s1301_s16, 4  ;;  %s972_s5 = int_to_ptr.vmem [resolvable:$true] %s971_s5 }
  0x43   :  { %719 = vmatmul.mubr.bf16.vlgmr.msra.gmra.mrb[4].mxu0 %v195_v17  ;;  %1181 = vmatprep.subr.bf16.mxu1 %v1299_v21  ;;  %v1044_v60 = vld [vmem:[%s1625_s4] ss:$0 sm:$0xff]  ;;  %s1274_s4 = scalar_lea.vmem %s972_s5, 32  ;;  %p1279_p1 = scmp.lt.s32.totalorder %s972_s5, %s972_s5 }
  0x44   :  { %1162 = vmatpush3.bf16.msra.mxu0 %v1262_v20  ;;  %1177 = vmatprep.mubr.msk.bf16.mxu0 %vm1300_vm0, %v1299_v21  ;;  %v1053_v4 = vld [vmem:[%s1627_s6] ss:$0 sm:$0xff]  ;;  %p1275_p0 = scmp.ne.s32.totalorder %s972_s5, %s1274_s4  ;;  %p1280_p2 = scmp.lt.s32.totalorder %s1274_s4, %s1274_s4 }
  0x45   :  { %759 = vmatmul.mubr.bf16.vlgmr.msra.gmra.mrb[4].mxu1 %v211_v19  ;;  %1163 = vmatprep.subr.bf16.mxu0 %v1299_v21 }
  0x46   :  { %1189 = vmatprep.mubr.msk.bf16.mxu1 %vm1300_vm0, %v1299_v21  ;;  %1182 = vmatpush3.bf16.msra.mxu1 %v1270_v29  ;;  %p1281_p3 = por %p1280_p2, %p1279_p1 }
  0x47   :  { %1183 = vmatprep.subr.bf16.mxu1 %v1299_v21 }
  0x48   :  { %1164 = vmatpush3.bf16.msra.mxu0 %v1263_v22  ;;  %p1282_p4 = pnand %p1281_p3, %p1275_p0 }
  0x49   :  { %1165 = vmatprep.subr.bf16.mxu0 %v1299_v21 }
  0x4a   :  { %1184 = vmatpush3.bf16.msra.mxu1 %v1271_v30 }
  0x4b   :  { %1185 = vmatprep.subr.bf16.mxu1 %v1299_v21 }
  0x4c   :  { %1166 = vmatpush3.bf16.msra.mxu0 %v1264_v23 }
  0x4d   :  { %1167 = vmatprep.subr.bf16.mxu0 %v1299_v21 }
  0x4e   :  { %1186 = vmatpush3.bf16.msra.mxu1 %v1272_v58 }
  0x4f   :  { %1187 = vmatprep.subr.bf16.mxu1 %v1299_v21 }
  0x50   :  { %1168 = vmatpush3.bf16.msra.mxu0 %v1265_v24 }
  0x51   :  { %1169 = vmatprep.subr.bf16.mxu0 %v1299_v21 }
  0x52   :  { %1188 = vmatpush3.bf16.msra.mxu1 %v1273_v59 }
  0x54   :  { %1170 = vmatpush3.bf16.msra.mxu0 %v1266_v25 }
  0x55   :  { %1171 = vmatprep.subr.bf16.mxu0 %v1299_v21 }
  0x58   :  { %1172 = vmatpush3.bf16.msra.mxu0 %v1267_v26 }
  0x59   :  { %1173 = vmatprep.subr.bf16.mxu0 %v1299_v21 }
  0x5c   :  { %1174 = vmatpush3.bf16.msra.mxu0 %v1268_v27 }
  0x5d   :  { %1175 = vmatprep.subr.bf16.mxu0 %v1299_v21 }
  0x60   :  { %1176 = vmatpush3.bf16.msra.mxu0 %v1269_v28 }
  0xf6   :  { %v1075_v31 = vpop.f32.mrb[0].mxu0 }
  0xf7   :  { %v1076_v33 = vpop.f32.mrb[1].mxu0  ;;  %v1097_v34 = vpop.f32.mrb[0].mxu1 }
  0xf8   :  { %v1077_v35 = vadd.f32 %v1076_v33, %v1075_v31  ;;  %v1078_v36 = vpop.f32.mrb[2].mxu0  ;;  %v1098_v37 = vpop.f32.mrb[1].mxu1 }
  0xf9   :  { %v1079_v38 = vpop.f32.mrb[3].mxu0  ;;  %v1099_v40 = vadd.f32 %v1098_v37, %v1097_v34  ;;  %v1100_v41 = vpop.f32.mrb[2].mxu1 }
  0xfa   :  { %v641_v39 = vadd.f32 %v1077_v35, %v979_v32  ;;  %v1101_v42 = vpop.f32.mrb[3].mxu1 }
  0xfc   :  { %v681_v43 = vadd.f32 %v1099_v40, %v641_v39 }
 0x116   :  { %v1119_v44 = vpop.f32.mrb[4].mxu0 }
 0x117   :  { %v1120_v45 = vpop.f32.mrb[5].mxu0 }
 0x118   :  { %v1141_v46 = vpop.f32.mrb[4].mxu1  ;;  %v1121_v47 = vadd.f32 %v1120_v45, %v1119_v44  ;;  %v1122_v48 = vpop.f32.mrb[6].mxu0 }
 0x119   :  { %v1142_v49 = vpop.f32.mrb[5].mxu1  ;;  %v1123_v50 = vpop.f32.mrb[7].mxu0 }
 0x11a   :  { %v721_v51 = vadd.f32 %v1121_v47, %v681_v43  ;;  %v1143_v52 = vadd.f32 %v1142_v49, %v1141_v46  ;;  %v1144_v53 = vpop.f32.mrb[6].mxu1 }
 0x11b   :  { %v1145_v54 = vpop.f32.mrb[7].mxu1 }
 0x11c   :  { %v761_v55 = vadd.f32 %v1143_v52, %v721_v51 }
 0x11e   :  { %v766_v56 = vmax.f32 %v761_v55, 0.0 }
 0x120   :  { %v767_v57 = vpack.c.bf16 %v766_v56, %v766_v56 }
 0x122   :  { %1178 = vmatmul.mubr.bf16.vlgmr.msra.gmra.mrb[8].mxu0 %v767_v57 }
 0x1f5   :  { %v873_v61 = vpop.f32.mrb[8].mxu0 }
 0x1f6   :  { %v874_v62 = vadd.f32 %v1044_v60, %v873_v61  ;;  %v1179_v63 = vpop.f32.mrb[9].mxu0 }
 0x1f7   :  { %v876_v0 = vpop.f32.mrb[10].mxu0 }
 0x1f8   :  { %v879_v1 = vmax.f32 %v874_v62, 0.0  ;;  %v1180_v2 = vpop.f32.mrb[11].mxu0 }
 0x1fa   :  { %v880_v3 = vpack.c.bf16 %v879_v1, %v879_v1 }
 0x1fc   :  { %1190 = vmatmul.mubr.msk.bf16.vlgmr.msra.gmra.mrb[8].mxu1 %vm920_vm1, %v880_v3 }
 0x2cf   :  { %v958_v5 = vpop.f32.mrb[8].mxu1 }
 0x2d0   :  { %v959_v6 = vadd.f32 %v1053_v4, %v958_v5  ;;  %v1191_v7 = vpop.f32.mrb[9].mxu1 }
 0x2d1   :  { %v961_v8 = vpop.f32.mrb[10].mxu1 }
 0x2d2   :  { %964 = vst [vmem:[#allocation2] sm:$0x3] %v959_v6  ;;  %v1192_v9 = vpop.f32.mrb[11].mxu1 }
 0x2d3   :  { %1285 = shalt.err (!%p1282_p4)
}
 0x2d4   :  { %s1286_s6 = scalar_lea.hbm %s1628_s7, 32 }
 0x2d5   :  { %p1287_p5 = scmp.ne.s32.totalorder %s1628_s7, %s1286_s6  ;;  %p1290_p6 = scmp.lt.u32.totalorder %s1286_s6, %s1628_s7 }
 0x2d7   :  { %p1292_p7 = pnand %p1290_p6, %p1287_p5 }
 0x2d9   :  { %1295 = shalt.err (!%p1292_p7)
}
 0x2da   :  { %974 = dma.vmem_to_hbm [thread:$0]  %s972_s5, 32, %s1628_s7, [#allocation3]  }
 0x2db   :  { %1296 = dma.done.wait [#allocation3], 32  }
 0x2dc   :  { %1297 = vsyncadd [#allocation3], 4294967264 }
 0x2dd   :  { %978 = vsyncpa [#allocation3], 1 }

</bundles_post_ra>
